<compile_context>
chip_gen: v6e
topology: v6e:2x2x1
jax: 0.10.0
libtpu: 0.0.40
codegen_flags: <defaults>
</compile_context>

<pallas_src>
import functools

import jax
import jax.numpy as jnp
import numpy as np
from jax.experimental import pallas as pl
from jax.experimental.pallas import tpu as pltpu


def _round_up(x, mult):
    return ((x + mult - 1) // mult) * mult


# ----------------------------------------------------------------------------
# Pass 1: conv-as-matmul (bf16 in, f32 acc) + per-chunk channel sum / sum-sq.
# Grid = (chunks, cout_tiles, m_tiles_per_chunk); stats reduce over the last
# ("arbitrary") axis into a VMEM scratch, written once at the last step.
# ----------------------------------------------------------------------------
def _conv_stats_kernel(p_ref, w_ref, conv_ref, stats_ref, acc_ref):
    k = pl.program_id(2)

    @pl.when(k == 0)
    def _init():
        acc_ref[...] = jnp.zeros_like(acc_ref)

    y = jnp.dot(p_ref[...], w_ref[...], preferred_element_type=jnp.float32)
    conv_ref[...] = y.astype(conv_ref.dtype)

    # Single merged (2, tn) accumulator update per grid step.
    acc_ref[...] += jnp.concatenate(
        (jnp.sum(y, axis=0, keepdims=True),
         jnp.sum(y * y, axis=0, keepdims=True)),
        axis=0,
    )

    @pl.when(k == pl.num_programs(2) - 1)
    def _finalize():
        stats_ref[0] = acc_ref[...]


# ----------------------------------------------------------------------------
# Pass 2: fused BatchNorm affine (precomputed scale/shift) + ReLU.
# ----------------------------------------------------------------------------
def _bn_relu_kernel(conv_ref, scale_ref, shift_ref, o_ref):
    y = conv_ref[...].astype(jnp.float32) * scale_ref[...] + shift_ref[...]
    o_ref[...] = jnp.maximum(y, 0.0).astype(o_ref.dtype)


def _im2col(x_nchw, kh, kw, stride, padding, dtype):
    """(N, Cin, H, W) -> (N*OH*OW, KH*KW*Cin) patches; K ordering = (kh, kw, cin)."""
    n, c, h, w = x_nchw.shape
    oh = (h + 2 * padding - kh) // stride + 1
    ow = (w + 2 * padding - kw) // stride + 1
    x = jnp.transpose(x_nchw, (0, 2, 3, 1)).astype(dtype)          # NHWC, bf16
    x = jnp.pad(x, ((0, 0), (padding, padding), (padding, padding), (0, 0)))
    cols = []
    for i in range(kh):
        for j in range(kw):
            cols.append(x[:, i:i + stride * oh:stride, j:j + stride * ow:stride, :])
    p = jnp.concatenate(cols, axis=-1)                              # (N, OH, OW, KH*KW*Cin)
    # TODO(synk): fuse this patch gather into the Pallas kernel (manual DMA windows
    # over the padded NHWC input) to avoid materializing the KH*KW expansion in HBM.
    return p.reshape(n * oh * ow, kh * kw * c), oh, ow


@functools.partial(
    jax.jit,
    static_argnames=("stride", "padding", "tm", "tn", "channels_last"))
def cnn_layer_forward(x, weight, bias, gamma, beta, *, stride=1, padding=0,
                      tm=256, tn=128, eps=1e-5, channels_last=False):
    """Conv2d + BatchNorm2d (training-mode batch stats) + ReLU.

    x: (N, Cin, H, W) f32, weight: (Cout, Cin, KH, KW), bias/gamma/beta: (Cout,)
    returns (N, Cout, OH, OW) f32 (or NHWC if channels_last=True).
    """
    n, cin, h, w = x.shape
    cout, _, kh, kw = weight.shape

    patches, oh, ow = _im2col(x, kh, kw, stride, padding, jnp.bfloat16)
    m, kdim = patches.shape

    # --- lane / row padding to TPU-friendly sizes ---------------------------
    coutp = _round_up(max(cout, tn), 128)          # lane-dense Cout
    tn = min(tn, coutp)
    tm = min(tm, _round_up(m, 8))
    m_pad = _round_up(m, tm)
    if m_pad != m:
        # zero rows contribute nothing to sum / sumsq -> stats stay exact.
        patches = jnp.pad(patches, ((0, m_pad - m), (0, 0)))

    total_tiles = m_pad // tm
    chunks = 2 if (total_tiles % 2 == 0 and total_tiles >= 2) else 1
    tpc = total_tiles // chunks                    # m-tiles per chunk
    cout_tiles = coutp // tn

    # Conv bias is exactly cancelled by BatchNorm's mean subtraction -> dropped.
    del bias
    w2 = weight.transpose(2, 3, 1, 0).reshape(kdim, cout)          # (kh,kw,cin) K order
    w2 = jnp.pad(w2, ((0, 0), (0, coutp - cout))).astype(jnp.bfloat16)

    # --- Pass 1: conv matmul + per-chunk channel sum / sumsq ----------------
    flops1 = 2 * m_pad * kdim * coutp
    bytes1 = (m_pad * kdim * 2) * cout_tiles + kdim * coutp * 2 \
        + m_pad * coutp * 2 + chunks * 2 * coutp * 4
    conv_out, stats = pl.pallas_call(
        _conv_stats_kernel,
        out_shape=(
            jax.ShapeDtypeStruct((m_pad, coutp), jnp.bfloat16),
            jax.ShapeDtypeStruct((chunks, 2, coutp), jnp.float32),
        ),
        grid=(chunks, cout_tiles, tpc),
        in_specs=[
            pl.BlockSpec((tm, kdim), lambda c, j, k: (c * tpc + k, 0)),
            pl.BlockSpec((kdim, tn), lambda c, j, k: (0, j)),
        ],
        out_specs=(
            pl.BlockSpec((tm, tn), lambda c, j, k: (c * tpc + k, j)),
            pl.BlockSpec((1, 2, tn), lambda c, j, k: (c, 0, j)),
        ),
        scratch_shapes=[pltpu.VMEM((2, tn), jnp.float32)],
        compiler_params=pltpu.CompilerParams(
            dimension_semantics=("parallel", "parallel", "arbitrary"),
            vmem_limit_bytes=32 * 1024 * 1024),
        cost_estimate=pl.CostEstimate(
            flops=flops1, transcendentals=0, bytes_accessed=bytes1),
    )(patches, w2)

    # --- tiny glue: finish BN batch statistics (biased variance, like PyTorch) ---
    stats_sum = jnp.sum(stats, axis=0)             # reduce per-chunk partials
    inv_m = 1.0 / float(m)                         # true M, not padded
    mean = stats_sum[0] * inv_m
    var = jnp.maximum(stats_sum[1] * inv_m - mean * mean, 0.0)
    gamma_p = jnp.pad(gamma.astype(jnp.float32), (0, coutp - cout))
    beta_p = jnp.pad(beta.astype(jnp.float32), (0, coutp - cout))
    scale = gamma_p * jax.lax.rsqrt(var + eps)
    shift = beta_p - mean * scale

    # --- Pass 2: fused BN affine + ReLU (large, HBM-bound row tiles) --------
    tm2 = m_pad
    for cand in (2048, 1024, 512, 256, 128, 64, 32, 16, 8):
        if m_pad % cand == 0:
            tm2 = cand
            break
    flops2 = 3 * m_pad * coutp
    bytes2 = m_pad * coutp * (2 + 4) + 2 * coutp * 4
    y = pl.pallas_call(
        _bn_relu_kernel,
        out_shape=jax.ShapeDtypeStruct((m_pad, coutp), jnp.float32),
        grid=(m_pad // tm2,),
        in_specs=[
            pl.BlockSpec((tm2, coutp), lambda i: (i, 0)),
            pl.BlockSpec((1, coutp), lambda i: (0, 0)),
            pl.BlockSpec((1, coutp), lambda i: (0, 0)),
        ],
        out_specs=pl.BlockSpec((tm2, coutp), lambda i: (i, 0)),
        compiler_params=pltpu.CompilerParams(
            dimension_semantics=("parallel",),
            vmem_limit_bytes=32 * 1024 * 1024),
        cost_estimate=pl.CostEstimate(
            flops=flops2, transcendentals=0, bytes_accessed=bytes2),
    )(conv_out, scale.reshape(1, coutp), shift.reshape(1, coutp))

    y = y[:m, :cout].reshape(n, oh, ow, cout)
    if channels_last:
        return y                                  # skip NCHW transpose if consumer allows
    return y.transpose(0, 3, 1, 2)


def _reference(x, weight, bias, gamma, beta, stride, padding, eps=1e-5):
    conv = jax.lax.conv_general_dilated(
        x, weight, (stride, stride),
        [(padding, padding), (padding, padding)],
        dimension_numbers=("NCHW", "OIHW", "NCHW"),
        precision=jax.lax.Precision.HIGHEST,
    ) + bias[None, :, None, None]
    mean = conv.mean(axis=(0, 2, 3), keepdims=True)
    var = conv.var(axis=(0, 2, 3), keepdims=True)   # biased, like PyTorch BN train
    y = (conv - mean) / jnp.sqrt(var + eps)
    y = y * gamma[None, :, None, None] + beta[None, :, None, None]
    return jnp.maximum(y, 0.0)


if __name__ == "__main__":
    # Small, deterministic synthetic setup (no checkpoint loading).
    N, Cin, H, W = 2, 4, 16, 16
    Cout, K, stride, padding = 8, 3, 1, 1

    key = jax.random.PRNGKey(0)
    kx, kw_, kb, kg, kbeta = jax.random.split(key, 5)
    x = jax.random.normal(kx, (N, Cin, H, W), jnp.float32)
    fan_in = Cin * K * K
    weight = jax.random.uniform(
        kw_, (Cout, Cin, K, K), jnp.float32,
        minval=-1.0 / np.sqrt(fan_in), maxval=1.0 / np.sqrt(fan_in))
    bias = jax.random.uniform(
        kb, (Cout,), jnp.float32,
        minval=-1.0 / np.sqrt(fan_in), maxval=1.0 / np.sqrt(fan_in))
    gamma = 1.0 + 0.1 * jax.random.normal(kg, (Cout,), jnp.float32)
    beta = 0.1 * jax.random.normal(kbeta, (Cout,), jnp.float32)

    out = cnn_layer_forward(x, weight, bias, gamma, beta,
                            stride=stride, padding=padding)
    out = jax.block_until_ready(out)

    ref = _reference(x, weight, bias, gamma, beta, stride, padding)
    # bf16 MXU operands + bf16 conv intermediate -> slightly looser tolerance than f32.
    np.testing.assert_allclose(np.asarray(out), np.asarray(ref),
                               rtol=5e-2, atol=5e-2)
    assert out.shape == (N, Cout, H, W)
    print("KERNEL_OK")
</pallas_src>

<mosaic_0001>
module attributes {stable_mosaic.version = 11 : i64} {
  func.func @_conv_stats_kernel(%arg0: i32, %arg1: i32, %arg2: i32, %arg3: memref<256x36xbf16, #tpu.memory_space<vmem>>, %arg4: memref<36x128xbf16, #tpu.memory_space<vmem>>, %arg5: memref<256x128xbf16, #tpu.memory_space<vmem>>, %arg6: memref<1x2x128xf32, #tpu.memory_space<vmem>>, %arg7: memref<2x128xf32, #tpu.memory_space<vmem>>) attributes {dimension_semantics = [#tpu.dimension_semantics<parallel>, #tpu.dimension_semantics<parallel>, #tpu.dimension_semantics<arbitrary>], iteration_bounds = array<i64: 2, 1, 1>, scalar_prefetch = 0 : i64, scratch_operands = 1 : i64, tpu.core_type = #tpu.core_type<tc>, window_params = [{transform_indices = @transform_0, window_bounds = array<i64: 256, 36>}, {transform_indices = @transform_1, window_bounds = array<i64: 36, 128>}, {transform_indices = @transform_2, window_bounds = array<i64: 256, 128>}, {transform_indices = @transform_3, window_bounds = array<i64: 1, 2, 128>}]} {
    %c0_i32 = arith.constant 0 : i32
    %0 = arith.cmpi eq, %arg2, %c0_i32 : i32
    %1 = arith.extui %0 : i1 to i32
    %c0_i32_0 = arith.constant 0 : i32
    %2 = arith.cmpi ne, %1, %c0_i32_0 : i32
    scf.if %2 {
      %cst_14 = arith.constant 0.000000e+00 : f32
      %20 = vector.broadcast %cst_14 : f32 to vector<2x128xf32>
      %c0_15 = arith.constant 0 : index
      %c0_16 = arith.constant 0 : index
      %21 = vector.load %arg7[%c0_15, %c0_16] : memref<2x128xf32, #tpu.memory_space<vmem>>, vector<2x128xf32>
      tpu.vector_store %arg7[%c0_15, %c0_16], %20 {strides = array<i32>} : memref<2x128xf32, #tpu.memory_space<vmem>>, vector<2x128xf32>,
    } else {
    }
    %c0 = arith.constant 0 : index
    %c0_1 = arith.constant 0 : index
    %3 = vector.load %arg3[%c0, %c0_1] : memref<256x36xbf16, #tpu.memory_space<vmem>>, vector<256x36xbf16>
    %c0_2 = arith.constant 0 : index
    %c0_3 = arith.constant 0 : index
    %4 = vector.load %arg4[%c0_2, %c0_3] : memref<36x128xbf16, #tpu.memory_space<vmem>>, vector<36x128xbf16>
    %cst = arith.constant dense<0.000000e+00> : vector<256x128xf32>
    %5 = tpu.matmul %3, %4, %cst {dimension_numbers = #tpu.dot_dimension_numbers<[1], [0], [0], [1], [0, 0, 1, 1], [], []>} : vector<256x36xbf16>, vector<36x128xbf16>, vector<256x128xf32> -> vector<256x128xf32>
    %6 = arith.truncf %5 : vector<256x128xf32> to vector<256x128xbf16>
    %c0_4 = arith.constant 0 : index
    %c0_5 = arith.constant 0 : index
    %7 = vector.load %arg5[%c0_4, %c0_5] : memref<256x128xbf16, #tpu.memory_space<vmem>>, vector<256x128xbf16>
    tpu.vector_store %arg5[%c0_4, %c0_5], %6 {strides = array<i32>} : memref<256x128xbf16, #tpu.memory_space<vmem>>, vector<256x128xbf16>,
    %c0_6 = arith.constant 0 : index
    %c0_7 = arith.constant 0 : index
    %8 = vector.load %arg7[%c0_6, %c0_7] : memref<2x128xf32, #tpu.memory_space<vmem>>, vector<2x128xf32>
    %cst_8 = arith.constant dense<0.000000e+00> : vector<128xf32>
    %9 = vector.multi_reduction <add>, %5, %cst_8 [0] : vector<256x128xf32> to vector<128xf32>
    %10 = vector.shape_cast %9 : vector<128xf32> to vector<1x128xf32>
    %11 = arith.mulf %5, %5 : vector<256x128xf32>
    %cst_9 = arith.constant dense<0.000000e+00> : vector<128xf32>
    %12 = vector.multi_reduction <add>, %11, %cst_9 [0] : vector<256x128xf32> to vector<128xf32>
    %13 = vector.shape_cast %12 : vector<128xf32> to vector<1x128xf32>
    %14 = tpu.concatenate %10, %13 in 0 : vector<1x128xf32>, vector<1x128xf32> -> vector<2x128xf32>
    %15 = arith.addf %8, %14 : vector<2x128xf32>
    %c0_10 = arith.constant 0 : index
    %c0_11 = arith.constant 0 : index
    %16 = vector.load %arg7[%c0_10, %c0_11] : memref<2x128xf32, #tpu.memory_space<vmem>>, vector<2x128xf32>
    tpu.vector_store %arg7[%c0_10, %c0_11], %15 {strides = array<i32>} : memref<2x128xf32, #tpu.memory_space<vmem>>, vector<2x128xf32>,
    %c0_i32_12 = arith.constant 0 : i32
    %17 = arith.cmpi eq, %arg2, %c0_i32_12 : i32
    %18 = arith.extui %17 : i1 to i32
    %c0_i32_13 = arith.constant 0 : i32
    %19 = arith.cmpi ne, %18, %c0_i32_13 : i32
    scf.if %19 {
      %c0_14 = arith.constant 0 : index
      %c0_15 = arith.constant 0 : index
      %20 = vector.load %arg7[%c0_14, %c0_15] : memref<2x128xf32, #tpu.memory_space<vmem>>, vector<2x128xf32>
      %c0_16 = arith.constant 0 : index
      %c0_17 = arith.constant 0 : index
      %c0_18 = arith.constant 0 : index
      %21 = vector.load %arg6[%c0_16, %c0_17, %c0_18] : memref<1x2x128xf32, #tpu.memory_space<vmem>>, vector<1x2x128xf32>
      %22 = vector.shape_cast %21 : vector<1x2x128xf32> to vector<2x128xf32>
      %23 = vector.shape_cast %20 : vector<2x128xf32> to vector<1x2x128xf32>
      tpu.vector_store %arg6[%c0_16, %c0_17, %c0_18], %23 {strides = array<i32>} : memref<1x2x128xf32, #tpu.memory_space<vmem>>, vector<1x2x128xf32>,
    } else {
    }
    return
  }
  func.func @transform_0(%arg0: i32, %arg1: i32, %arg2: i32) -> (i32, i32) {
    %c1_i32 = arith.constant 1 : i32
    %0 = arith.muli %arg0, %c1_i32 : i32
    %1 = arith.addi %0, %arg2 : i32
    %c0_i32 = arith.constant 0 : i32
    %c0_i32_0 = arith.constant 0 : i32
    return %1, %c0_i32 : i32, i32
  }
  func.func @transform_1(%arg0: i32, %arg1: i32, %arg2: i32) -> (i32, i32) {
    %c0_i32 = arith.constant 0 : i32
    %c0_i32_0 = arith.constant 0 : i32
    return %c0_i32, %arg1 : i32, i32
  }
  func.func @transform_2(%arg0: i32, %arg1: i32, %arg2: i32) -> (i32, i32) {
    %c1_i32 = arith.constant 1 : i32
    %0 = arith.muli %arg0, %c1_i32 : i32
    %1 = arith.addi %0, %arg2 : i32
    %c0_i32 = arith.constant 0 : i32
    return %1, %arg1 : i32, i32
  }
  func.func @transform_3(%arg0: i32, %arg1: i32, %arg2: i32) -> (i32, i32, i32) {
    %c0_i32 = arith.constant 0 : i32
    %c0_i32_0 = arith.constant 0 : i32
    return %arg0, %c0_i32, %arg1 : i32, i32, i32
  }
}

module attributes {stable_mosaic.version = 11 : i64} {
  func.func @_bn_relu_kernel(%arg0: i32, %arg1: memref<512x128xbf16, #tpu.memory_space<vmem>>, %arg2: memref<1x128xf32, #tpu.memory_space<vmem>>, %arg3: memref<1x128xf32, #tpu.memory_space<vmem>>, %arg4: memref<512x128xf32, #tpu.memory_space<vmem>>) attributes {dimension_semantics = [#tpu.dimension_semantics<parallel>], iteration_bounds = array<i64: 1>, scalar_prefetch = 0 : i64, scratch_operands = 0 : i64, tpu.core_type = #tpu.core_type<tc>, window_params = [{transform_indices = @transform_0, window_bounds = array<i64: 512, 128>}, {pipeline_mode = #tpu.pipeline_mode<synchronous>, transform_indices = @transform_1, window_bounds = array<i64: 1, 128>}, {pipeline_mode = #tpu.pipeline_mode<synchronous>, transform_indices = @transform_2, window_bounds = array<i64: 1, 128>}, {transform_indices = @transform_3, window_bounds = array<i64: 512, 128>}]} {
    %c0 = arith.constant 0 : index
    %c0_0 = arith.constant 0 : index
    %0 = vector.load %arg1[%c0, %c0_0] : memref<512x128xbf16, #tpu.memory_space<vmem>>, vector<512x128xbf16>
    %1 = arith.extf %0 : vector<512x128xbf16> to vector<512x128xf32>
    %c0_1 = arith.constant 0 : index
    %c0_2 = arith.constant 0 : index
    %2 = vector.load %arg2[%c0_1, %c0_2] : memref<1x128xf32, #tpu.memory_space<vmem>>, vector<1x128xf32>
    %3 = vector.broadcast %2 : vector<1x128xf32> to vector<512x128xf32>
    %4 = arith.mulf %1, %3 : vector<512x128xf32>
    %c0_3 = arith.constant 0 : index
    %c0_4 = arith.constant 0 : index
    %5 = vector.load %arg3[%c0_3, %c0_4] : memref<1x128xf32, #tpu.memory_space<vmem>>, vector<1x128xf32>
    %6 = vector.broadcast %5 : vector<1x128xf32> to vector<512x128xf32>
    %7 = arith.addf %4, %6 : vector<512x128xf32>
    %cst = arith.constant 0.000000e+00 : f32
    %8 = vector.broadcast %cst : f32 to vector<512x128xf32>
    %9 = arith.maximumf %7, %8 : vector<512x128xf32>
    %c0_5 = arith.constant 0 : index
    %c0_6 = arith.constant 0 : index
    %10 = vector.load %arg4[%c0_5, %c0_6] : memref<512x128xf32, #tpu.memory_space<vmem>>, vector<512x128xf32>
    tpu.vector_store %arg4[%c0_5, %c0_6], %9 {strides = array<i32>} : memref<512x128xf32, #tpu.memory_space<vmem>>, vector<512x128xf32>,
    return
  }
  func.func @transform_0(%arg0: i32) -> (i32, i32) {
    %c0_i32 = arith.constant 0 : i32
    %c0_i32_0 = arith.constant 0 : i32
    return %arg0, %c0_i32 : i32, i32
  }
  func.func @transform_1(%arg0: i32) -> (i32, i32) {
    %c0_i32 = arith.constant 0 : i32
    %c0_i32_0 = arith.constant 0 : i32
    %c0_i32_1 = arith.constant 0 : i32
    return %c0_i32, %c0_i32_0 : i32, i32
  }
  func.func @transform_2(%arg0: i32) -> (i32, i32) {
    %c0_i32 = arith.constant 0 : i32
    %c0_i32_0 = arith.constant 0 : i32
    %c0_i32_1 = arith.constant 0 : i32
    return %c0_i32, %c0_i32_0 : i32, i32
  }
  func.func @transform_3(%arg0: i32) -> (i32, i32) {
    %c0_i32 = arith.constant 0 : i32
    %c0_i32_0 = arith.constant 0 : i32
    return %arg0, %c0_i32 : i32, i32
  }
}

</mosaic_0001>

<bundles_post_ra>
// kernel: cnn_layer_forward.3
= control target key start
LH: loop header
LB: loop body
LE: loop exit
PB: predicated region body
PF: predicated region fallthrough
CT: control target
= control target key end

     0   :  { %s1023_s0 = inlined_call_operand.vmem [shape: bf16[512,128], index: 0, kind: input, shape index: {}]   ;;  %s1024_s1 = inlined_call_operand.vmem [shape: f32[1,128], index: 1, kind: input, shape index: {}]   ;;  %s1025_s2 = inlined_call_operand.vmem [shape: f32[1,128], index: 2, kind: input, shape index: {}]   ;;  %s1026_s3 = inlined_call_operand.vmem [shape: f32[512,128], index: 3, kind: output, shape index: {}]  }
   0x1   :  { %v419_v0 = vld [vmem:[%s1023_s0] sm:$0xff]   ;;  %v546_v4 = vld [vmem:[%s1023_s0 + $0x8] sm:$0xff]   ;;  %v547_v5 = vld [vmem:[%s1023_s0 + $0x10] sm:$0xff]  }
   0x2   :  { %v603_v1 = vld [vmem:[%s1024_s1] ss:$0 sm:$0xff]  ;;  %v420_v2 = vunpack.c.l.bf16 %v419_v0  ;;  %v421_v3 = vunpack.c.h.bf16 %v419_v0  ;;  %v548_v6 = vld [vmem:[%s1023_s0 + $0x18] sm:$0xff]   ;;  %v424_v8 = vunpack.c.l.bf16 %v546_v4  ;;  %v425_v9 = vunpack.c.h.bf16 %v546_v4  ;;  %v550_v33 = vld [vmem:[%s1023_s0 + $0x28] sm:$0xff]  }
   0x3   :  { %v617_v7 = vld [vmem:[%s1025_s2] ss:$0 sm:$0xff]  ;;  %v428_v10 = vunpack.c.l.bf16 %v547_v5  ;;  %v429_v11 = vunpack.c.h.bf16 %v547_v5  ;;  %v432_v14 = vunpack.c.l.bf16 %v548_v6  ;;  %v433_v15 = vunpack.c.h.bf16 %v548_v6  ;;  %v551_v34 = vld [vmem:[%s1023_s0 + $0x30] sm:$0xff]   ;;  %v552_v39 = vld [vmem:[%s1023_s0 + $0x38] sm:$0xff]  }
   0x4   :  { %v149_v12 = vmul.f32 %v420_v2, %v603_v1  ;;  %v150_v13 = vmul.f32 %v421_v3, %v603_v1  ;;  %v151_v16 = vmul.f32 %v424_v8, %v603_v1  ;;  %v152_v17 = vmul.f32 %v425_v9, %v603_v1  ;;  %v549_v28 = vld [vmem:[%s1023_s0 + $0x20] sm:$0xff]   ;;  %v554_v6 = vld [vmem:[%s1023_s0 + $0x48] sm:$0xff]   ;;  %v555_v8 = vld [vmem:[%s1023_s0 + $0x50] sm:$0xff]  }
   0x5   :  { %v153_v18 = vmul.f32 %v428_v10, %v603_v1  ;;  %v154_v19 = vmul.f32 %v429_v11, %v603_v1  ;;  %v155_v22 = vmul.f32 %v432_v14, %v603_v1  ;;  %v156_v23 = vmul.f32 %v433_v15, %v603_v1  ;;  %v553_v0 = vld [vmem:[%s1023_s0 + $0x40] sm:$0xff]  }
   0x6   :  { %v220_v20 = vadd.f32 %v617_v7, %v149_v12  ;;  %v221_v21 = vadd.f32 %v617_v7, %v150_v13  ;;  %v222_v24 = vadd.f32 %v617_v7, %v151_v16  ;;  %v223_v25 = vadd.f32 %v617_v7, %v152_v17  ;;  %v556_v13 = vld [vmem:[%s1023_s0 + $0x58] sm:$0xff]  }
   0x7   :  { %v224_v26 = vadd.f32 %v617_v7, %v153_v18  ;;  %v225_v27 = vadd.f32 %v617_v7, %v154_v19  ;;  %v226_v31 = vadd.f32 %v617_v7, %v155_v22  ;;  %v227_v32 = vadd.f32 %v617_v7, %v156_v23 }
   0x8   :  { %v284_v29 = vmax.f32 %v220_v20, 0.0  ;;  %v285_v30 = vmax.f32 %v221_v21, 0.0  ;;  %v286_v35 = vmax.f32 %v222_v24, 0.0  ;;  %v287_v36 = vmax.f32 %v223_v25, 0.0 }
   0x9   :  { %v288_v37 = vmax.f32 %v224_v26, 0.0  ;;  %v289_v38 = vmax.f32 %v225_v27, 0.0  ;;  %v290_v40 = vmax.f32 %v226_v31, 0.0  ;;  %v291_v41 = vmax.f32 %v227_v32, 0.0 }
   0xa   :  { %348 = vst [vmem:[%s1026_s3] sm:$0xff] %v284_v29  ;;  %349 = vst [vmem:[%s1026_s3 + $0x8] sm:$0xff] %v285_v30  ;;  %v436_v42 = vunpack.c.l.bf16 %v549_v28  ;;  %v437_v43 = vunpack.c.h.bf16 %v549_v28  ;;  %v440_v44 = vunpack.c.l.bf16 %v550_v33  ;;  %v441_v45 = vunpack.c.h.bf16 %v550_v33 }
   0xb   :  { %350 = vst [vmem:[%s1026_s3 + $0x10] sm:$0xff] %v286_v35  ;;  %351 = vst [vmem:[%s1026_s3 + $0x18] sm:$0xff] %v287_v36  ;;  %v444_v46 = vunpack.c.l.bf16 %v551_v34  ;;  %v445_v47 = vunpack.c.h.bf16 %v551_v34  ;;  %v448_v50 = vunpack.c.l.bf16 %v552_v39  ;;  %v449_v51 = vunpack.c.h.bf16 %v552_v39 }
   0xc   :  { %352 = vst [vmem:[%s1026_s3 + $0x20] sm:$0xff] %v288_v37  ;;  %353 = vst [vmem:[%s1026_s3 + $0x28] sm:$0xff] %v289_v38  ;;  %v157_v48 = vmul.f32 %v436_v42, %v603_v1  ;;  %v158_v49 = vmul.f32 %v437_v43, %v603_v1  ;;  %v159_v52 = vmul.f32 %v440_v44, %v603_v1  ;;  %v452_v16 = vunpack.c.l.bf16 %v553_v0  ;;  %v557_v38 = vld [vmem:[%s1023_s0 + $0x60] sm:$0xff]   ;;  %v558_v43 = vld [vmem:[%s1023_s0 + $0x68] sm:$0xff]  }
   0xd   :  { %354 = vst [vmem:[%s1026_s3 + $0x30] sm:$0xff] %v290_v40  ;;  %355 = vst [vmem:[%s1026_s3 + $0x38] sm:$0xff] %v291_v41  ;;  %v160_v53 = vmul.f32 %v441_v45, %v603_v1  ;;  %v161_v54 = vmul.f32 %v444_v46, %v603_v1  ;;  %v162_v55 = vmul.f32 %v445_v47, %v603_v1  ;;  %v453_v17 = vunpack.c.h.bf16 %v553_v0  ;;  %v559_v44 = vld [vmem:[%s1023_s0 + $0x70] sm:$0xff]  }
   0xe   :  { %v228_v56 = vadd.f32 %v617_v7, %v157_v48  ;;  %v229_v57 = vadd.f32 %v617_v7, %v158_v49  ;;  %v163_v58 = vmul.f32 %v448_v50, %v603_v1  ;;  %v164_v59 = vmul.f32 %v449_v51, %v603_v1  ;;  %v560_v49 = vld [vmem:[%s1023_s0 + $0x78] sm:$0xff]  }
   0xf   :  { %v230_v60 = vadd.f32 %v617_v7, %v159_v52  ;;  %v231_v61 = vadd.f32 %v617_v7, %v160_v53  ;;  %v232_v62 = vadd.f32 %v617_v7, %v161_v54  ;;  %v233_v63 = vadd.f32 %v617_v7, %v162_v55 }
  0x10   :  { %v292_v2 = vmax.f32 %v228_v56, 0.0  ;;  %v293_v3 = vmax.f32 %v229_v57, 0.0  ;;  %v234_v4 = vadd.f32 %v617_v7, %v163_v58  ;;  %v235_v5 = vadd.f32 %v617_v7, %v164_v59 }
  0x11   :  { %v294_v9 = vmax.f32 %v230_v60, 0.0  ;;  %v295_v10 = vmax.f32 %v231_v61, 0.0  ;;  %v296_v11 = vmax.f32 %v232_v62, 0.0  ;;  %v297_v12 = vmax.f32 %v233_v63, 0.0 }
  0x12   :  { %356 = vst [vmem:[%s1026_s3 + $0x40] sm:$0xff] %v292_v2  ;;  %357 = vst [vmem:[%s1026_s3 + $0x48] sm:$0xff] %v293_v3  ;;  %v298_v14 = vmax.f32 %v234_v4, 0.0  ;;  %v299_v15 = vmax.f32 %v235_v5, 0.0  ;;  %v456_v18 = vunpack.c.l.bf16 %v554_v6  ;;  %v457_v19 = vunpack.c.h.bf16 %v554_v6 }
  0x13   :  { %358 = vst [vmem:[%s1026_s3 + $0x50] sm:$0xff] %v294_v9  ;;  %359 = vst [vmem:[%s1026_s3 + $0x58] sm:$0xff] %v295_v10  ;;  %v460_v20 = vunpack.c.l.bf16 %v555_v8  ;;  %v461_v21 = vunpack.c.h.bf16 %v555_v8  ;;  %v165_v22 = vmul.f32 %v452_v16, %v603_v1  ;;  %v166_v23 = vmul.f32 %v453_v17, %v603_v1  ;;  %v562_v17 = vld [vmem:[%s1023_s0 + $0x88] sm:$0xff]  }
  0x14   :  { %360 = vst [vmem:[%s1026_s3 + $0x60] sm:$0xff] %v296_v11  ;;  %361 = vst [vmem:[%s1026_s3 + $0x68] sm:$0xff] %v297_v12  ;;  %v464_v24 = vunpack.c.l.bf16 %v556_v13  ;;  %v465_v25 = vunpack.c.h.bf16 %v556_v13  ;;  %v167_v26 = vmul.f32 %v456_v18, %v603_v1  ;;  %v168_v27 = vmul.f32 %v457_v19, %v603_v1  ;;  %v561_v12 = vld [vmem:[%s1023_s0 + $0x80] sm:$0xff]   ;;  %v563_v18 = vld [vmem:[%s1023_s0 + $0x90] sm:$0xff]  }
  0x15   :  { %362 = vst [vmem:[%s1026_s3 + $0x70] sm:$0xff] %v298_v14  ;;  %363 = vst [vmem:[%s1026_s3 + $0x78] sm:$0xff] %v299_v15  ;;  %v169_v28 = vmul.f32 %v460_v20, %v603_v1  ;;  %v170_v29 = vmul.f32 %v461_v21, %v603_v1  ;;  %v236_v30 = vadd.f32 %v617_v7, %v165_v22  ;;  %v468_v52 = vunpack.c.l.bf16 %v557_v38 }
  0x16   :  { %v237_v31 = vadd.f32 %v617_v7, %v166_v23  ;;  %v171_v32 = vmul.f32 %v464_v24, %v603_v1  ;;  %v172_v33 = vmul.f32 %v465_v25, %v603_v1  ;;  %v238_v34 = vadd.f32 %v617_v7, %v167_v26  ;;  %v564_v23 = vld [vmem:[%s1023_s0 + $0x98] sm:$0xff]  }
  0x17   :  { %v239_v35 = vadd.f32 %v617_v7, %v168_v27  ;;  %v240_v36 = vadd.f32 %v617_v7, %v169_v28  ;;  %v241_v37 = vadd.f32 %v617_v7, %v170_v29  ;;  %v300_v39 = vmax.f32 %v236_v30, 0.0 }
  0x18   :  { %v301_v40 = vmax.f32 %v237_v31, 0.0  ;;  %v242_v41 = vadd.f32 %v617_v7, %v171_v32  ;;  %v243_v42 = vadd.f32 %v617_v7, %v172_v33  ;;  %v302_v45 = vmax.f32 %v238_v34, 0.0 }
  0x19   :  { %v303_v46 = vmax.f32 %v239_v35, 0.0  ;;  %v304_v47 = vmax.f32 %v240_v36, 0.0  ;;  %v305_v48 = vmax.f32 %v241_v37, 0.0  ;;  %364 = vst [vmem:[%s1026_s3 + $0x80] sm:$0xff] %v300_v39  ;;  %v469_v53 = vunpack.c.h.bf16 %v557_v38 }
  0x1a   :  { %365 = vst [vmem:[%s1026_s3 + $0x88] sm:$0xff] %v301_v40  ;;  %v306_v50 = vmax.f32 %v242_v41, 0.0  ;;  %v307_v51 = vmax.f32 %v243_v42, 0.0  ;;  %366 = vst [vmem:[%s1026_s3 + $0x90] sm:$0xff] %v302_v45  ;;  %v472_v54 = vunpack.c.l.bf16 %v558_v43  ;;  %v473_v55 = vunpack.c.h.bf16 %v558_v43 }
  0x1b   :  { %367 = vst [vmem:[%s1026_s3 + $0x98] sm:$0xff] %v303_v46  ;;  %368 = vst [vmem:[%s1026_s3 + $0xa0] sm:$0xff] %v304_v47  ;;  %v476_v56 = vunpack.c.l.bf16 %v559_v44  ;;  %v477_v57 = vunpack.c.h.bf16 %v559_v44  ;;  %v173_v58 = vmul.f32 %v468_v52, %v603_v1  ;;  %v174_v59 = vmul.f32 %v469_v53, %v603_v1  ;;  %v566_v53 = vld [vmem:[%s1023_s0 + $0xa8] sm:$0xff]  }
  0x1c   :  { %369 = vst [vmem:[%s1026_s3 + $0xa8] sm:$0xff] %v305_v48  ;;  %370 = vst [vmem:[%s1026_s3 + $0xb0] sm:$0xff] %v306_v50  ;;  %v480_v60 = vunpack.c.l.bf16 %v560_v49  ;;  %v481_v61 = vunpack.c.h.bf16 %v560_v49  ;;  %v175_v62 = vmul.f32 %v472_v54, %v603_v1  ;;  %v176_v63 = vmul.f32 %v473_v55, %v603_v1  ;;  %v565_v48 = vld [vmem:[%s1023_s0 + $0xa0] sm:$0xff]   ;;  %v567_v54 = vld [vmem:[%s1023_s0 + $0xb0] sm:$0xff]  }
  0x1d   :  { %371 = vst [vmem:[%s1026_s3 + $0xb8] sm:$0xff] %v307_v51  ;;  %v177_v0 = vmul.f32 %v476_v56, %v603_v1  ;;  %v178_v2 = vmul.f32 %v477_v57, %v603_v1  ;;  %v244_v3 = vadd.f32 %v617_v7, %v173_v58  ;;  %v245_v4 = vadd.f32 %v617_v7, %v174_v59  ;;  %v568_v59 = vld [vmem:[%s1023_s0 + $0xb8] sm:$0xff]  }
  0x1e   :  { %v179_v5 = vmul.f32 %v480_v60, %v603_v1  ;;  %v180_v6 = vmul.f32 %v481_v61, %v603_v1  ;;  %v246_v8 = vadd.f32 %v617_v7, %v175_v62  ;;  %v247_v9 = vadd.f32 %v617_v7, %v176_v63 }
  0x1f   :  { %v248_v10 = vadd.f32 %v617_v7, %v177_v0  ;;  %v249_v11 = vadd.f32 %v617_v7, %v178_v2  ;;  %v308_v13 = vmax.f32 %v244_v3, 0.0  ;;  %v309_v14 = vmax.f32 %v245_v4, 0.0 }
  0x20   :  { %v250_v15 = vadd.f32 %v617_v7, %v179_v5  ;;  %v251_v16 = vadd.f32 %v617_v7, %v180_v6  ;;  %v310_v19 = vmax.f32 %v246_v8, 0.0  ;;  %v311_v20 = vmax.f32 %v247_v9, 0.0 }
  0x21   :  { %v312_v21 = vmax.f32 %v248_v10, 0.0  ;;  %v313_v22 = vmax.f32 %v249_v11, 0.0  ;;  %372 = vst [vmem:[%s1026_s3 + $0xc0] sm:$0xff] %v308_v13  ;;  %373 = vst [vmem:[%s1026_s3 + $0xc8] sm:$0xff] %v309_v14  ;;  %v484_v26 = vunpack.c.l.bf16 %v561_v12  ;;  %v485_v27 = vunpack.c.h.bf16 %v561_v12 }
  0x22   :  { %v314_v24 = vmax.f32 %v250_v15, 0.0  ;;  %v315_v25 = vmax.f32 %v251_v16, 0.0  ;;  %374 = vst [vmem:[%s1026_s3 + $0xd0] sm:$0xff] %v310_v19  ;;  %375 = vst [vmem:[%s1026_s3 + $0xd8] sm:$0xff] %v311_v20  ;;  %v488_v28 = vunpack.c.l.bf16 %v562_v17  ;;  %v489_v29 = vunpack.c.h.bf16 %v562_v17 }
  0x23   :  { %376 = vst [vmem:[%s1026_s3 + $0xe0] sm:$0xff] %v312_v21  ;;  %377 = vst [vmem:[%s1026_s3 + $0xe8] sm:$0xff] %v313_v22  ;;  %v492_v30 = vunpack.c.l.bf16 %v563_v18  ;;  %v493_v31 = vunpack.c.h.bf16 %v563_v18  ;;  %v181_v32 = vmul.f32 %v484_v26, %v603_v1  ;;  %v182_v33 = vmul.f32 %v485_v27, %v603_v1  ;;  %v569_v22 = vld [vmem:[%s1023_s0 + $0xc0] sm:$0xff]   ;;  %v570_v27 = vld [vmem:[%s1023_s0 + $0xc8] sm:$0xff]  }
  0x24   :  { %378 = vst [vmem:[%s1026_s3 + $0xf0] sm:$0xff] %v314_v24  ;;  %379 = vst [vmem:[%s1026_s3 + $0xf8] sm:$0xff] %v315_v25  ;;  %v496_v34 = vunpack.c.l.bf16 %v564_v23  ;;  %v497_v35 = vunpack.c.h.bf16 %v564_v23  ;;  %v183_v36 = vmul.f32 %v488_v28, %v603_v1  ;;  %v184_v37 = vmul.f32 %v489_v29, %v603_v1  ;;  %v571_v28 = vld [vmem:[%s1023_s0 + $0xd0] sm:$0xff]  }
  0x25   :  { %v185_v38 = vmul.f32 %v492_v30, %v603_v1  ;;  %v186_v39 = vmul.f32 %v493_v31, %v603_v1  ;;  %v252_v40 = vadd.f32 %v617_v7, %v181_v32  ;;  %v253_v41 = vadd.f32 %v617_v7, %v182_v33  ;;  %v572_v33 = vld [vmem:[%s1023_s0 + $0xd8] sm:$0xff]  }
  0x26   :  { %v187_v42 = vmul.f32 %v496_v34, %v603_v1  ;;  %v188_v43 = vmul.f32 %v497_v35, %v603_v1  ;;  %v254_v44 = vadd.f32 %v617_v7, %v183_v36  ;;  %v255_v45 = vadd.f32 %v617_v7, %v184_v37 }
  0x27   :  { %v256_v46 = vadd.f32 %v617_v7, %v185_v38  ;;  %v257_v47 = vadd.f32 %v617_v7, %v186_v39  ;;  %v316_v49 = vmax.f32 %v252_v40, 0.0  ;;  %v317_v50 = vmax.f32 %v253_v41, 0.0 }
  0x28   :  { %v258_v51 = vadd.f32 %v617_v7, %v187_v42  ;;  %v259_v52 = vadd.f32 %v617_v7, %v188_v43  ;;  %v318_v55 = vmax.f32 %v254_v44, 0.0  ;;  %v319_v56 = vmax.f32 %v255_v45, 0.0 }
  0x29   :  { %v320_v57 = vmax.f32 %v256_v46, 0.0  ;;  %v321_v58 = vmax.f32 %v257_v47, 0.0  ;;  %380 = vst [vmem:[%s1026_s3 + $0x100] sm:$0xff] %v316_v49  ;;  %381 = vst [vmem:[%s1026_s3 + $0x108] sm:$0xff] %v317_v50  ;;  %v500_v62 = vunpack.c.l.bf16 %v565_v48  ;;  %v501_v63 = vunpack.c.h.bf16 %v565_v48 }
  0x2a   :  { %v322_v60 = vmax.f32 %v258_v51, 0.0  ;;  %v323_v61 = vmax.f32 %v259_v52, 0.0  ;;  %382 = vst [vmem:[%s1026_s3 + $0x110] sm:$0xff] %v318_v55  ;;  %383 = vst [vmem:[%s1026_s3 + $0x118] sm:$0xff] %v319_v56  ;;  %v504_v0 = vunpack.c.l.bf16 %v566_v53  ;;  %v505_v2 = vunpack.c.h.bf16 %v566_v53 }
  0x2b   :  { %384 = vst [vmem:[%s1026_s3 + $0x120] sm:$0xff] %v320_v57  ;;  %385 = vst [vmem:[%s1026_s3 + $0x128] sm:$0xff] %v321_v58  ;;  %v508_v3 = vunpack.c.l.bf16 %v567_v54  ;;  %v509_v4 = vunpack.c.h.bf16 %v567_v54  ;;  %v189_v5 = vmul.f32 %v500_v62, %v603_v1  ;;  %v190_v6 = vmul.f32 %v501_v63, %v603_v1  ;;  %v573_v58 = vld [vmem:[%s1023_s0 + $0xe0] sm:$0xff]   ;;  %v574_v63 = vld [vmem:[%s1023_s0 + $0xe8] sm:$0xff]  }
  0x2c   :  { %386 = vst [vmem:[%s1026_s3 + $0x130] sm:$0xff] %v322_v60  ;;  %387 = vst [vmem:[%s1026_s3 + $0x138] sm:$0xff] %v323_v61  ;;  %v512_v8 = vunpack.c.l.bf16 %v568_v59  ;;  %v513_v9 = vunpack.c.h.bf16 %v568_v59  ;;  %v191_v10 = vmul.f32 %v504_v0, %v603_v1  ;;  %v192_v11 = vmul.f32 %v505_v2, %v603_v1  ;;  %v575_v0 = vld [vmem:[%s1023_s0 + $0xf0] sm:$0xff]  }
  0x2d   :  { %v193_v12 = vmul.f32 %v508_v3, %v603_v1  ;;  %v194_v13 = vmul.f32 %v509_v4, %v603_v1  ;;  %v260_v14 = vadd.f32 %v617_v7, %v189_v5  ;;  %v261_v15 = vadd.f32 %v617_v7, %v190_v6  ;;  %v576_v6 = vld [vmem:[%s1023_s0 + $0xf8] sm:$0xff]  }
  0x2e   :  { %v195_v16 = vmul.f32 %v512_v8, %v603_v1  ;;  %v196_v17 = vmul.f32 %v513_v9, %v603_v1  ;;  %v262_v18 = vadd.f32 %v617_v7, %v191_v10  ;;  %v263_v19 = vadd.f32 %v617_v7, %v192_v11 }
  0x2f   :  { %v264_v20 = vadd.f32 %v617_v7, %v193_v12  ;;  %v265_v21 = vadd.f32 %v617_v7, %v194_v13  ;;  %v324_v23 = vmax.f32 %v260_v14, 0.0  ;;  %v325_v24 = vmax.f32 %v261_v15, 0.0 }
  0x30   :  { %v266_v25 = vadd.f32 %v617_v7, %v195_v16  ;;  %v267_v26 = vadd.f32 %v617_v7, %v196_v17  ;;  %v326_v29 = vmax.f32 %v262_v18, 0.0  ;;  %v327_v30 = vmax.f32 %v263_v19, 0.0 }
  0x31   :  { %v328_v31 = vmax.f32 %v264_v20, 0.0  ;;  %v329_v32 = vmax.f32 %v265_v21, 0.0  ;;  %388 = vst [vmem:[%s1026_s3 + $0x140] sm:$0xff] %v324_v23  ;;  %389 = vst [vmem:[%s1026_s3 + $0x148] sm:$0xff] %v325_v24  ;;  %v516_v36 = vunpack.c.l.bf16 %v569_v22  ;;  %v517_v37 = vunpack.c.h.bf16 %v569_v22 }
  0x32   :  { %v330_v34 = vmax.f32 %v266_v25, 0.0  ;;  %v331_v35 = vmax.f32 %v267_v26, 0.0  ;;  %390 = vst [vmem:[%s1026_s3 + $0x150] sm:$0xff] %v326_v29  ;;  %391 = vst [vmem:[%s1026_s3 + $0x158] sm:$0xff] %v327_v30  ;;  %v520_v38 = vunpack.c.l.bf16 %v570_v27  ;;  %v521_v39 = vunpack.c.h.bf16 %v570_v27 }
  0x33   :  { %392 = vst [vmem:[%s1026_s3 + $0x160] sm:$0xff] %v328_v31  ;;  %393 = vst [vmem:[%s1026_s3 + $0x168] sm:$0xff] %v329_v32  ;;  %v524_v40 = vunpack.c.l.bf16 %v571_v28  ;;  %v525_v41 = vunpack.c.h.bf16 %v571_v28  ;;  %v197_v42 = vmul.f32 %v516_v36, %v603_v1  ;;  %v198_v43 = vmul.f32 %v517_v37, %v603_v1 }
  0x34   :  { %394 = vst [vmem:[%s1026_s3 + $0x170] sm:$0xff] %v330_v34  ;;  %395 = vst [vmem:[%s1026_s3 + $0x178] sm:$0xff] %v331_v35  ;;  %v528_v44 = vunpack.c.l.bf16 %v572_v33  ;;  %v529_v45 = vunpack.c.h.bf16 %v572_v33  ;;  %v199_v46 = vmul.f32 %v520_v38, %v603_v1  ;;  %v200_v47 = vmul.f32 %v521_v39, %v603_v1 }
  0x35   :  { %v201_v48 = vmul.f32 %v524_v40, %v603_v1  ;;  %v202_v49 = vmul.f32 %v525_v41, %v603_v1  ;;  %v268_v50 = vadd.f32 %v617_v7, %v197_v42  ;;  %v269_v51 = vadd.f32 %v617_v7, %v198_v43 }
  0x36   :  { %v203_v52 = vmul.f32 %v528_v44, %v603_v1  ;;  %v204_v53 = vmul.f32 %v529_v45, %v603_v1  ;;  %v270_v54 = vadd.f32 %v617_v7, %v199_v46  ;;  %v271_v55 = vadd.f32 %v617_v7, %v200_v47 }
  0x37   :  { %v272_v56 = vadd.f32 %v617_v7, %v201_v48  ;;  %v273_v57 = vadd.f32 %v617_v7, %v202_v49  ;;  %v332_v59 = vmax.f32 %v268_v50, 0.0  ;;  %v333_v60 = vmax.f32 %v269_v51, 0.0 }
  0x38   :  { %v274_v61 = vadd.f32 %v617_v7, %v203_v52  ;;  %v275_v62 = vadd.f32 %v617_v7, %v204_v53  ;;  %v334_v2 = vmax.f32 %v270_v54, 0.0  ;;  %v335_v3 = vmax.f32 %v271_v55, 0.0 }
  0x39   :  { %v336_v4 = vmax.f32 %v272_v56, 0.0  ;;  %v337_v5 = vmax.f32 %v273_v57, 0.0  ;;  %396 = vst [vmem:[%s1026_s3 + $0x180] sm:$0xff] %v332_v59  ;;  %397 = vst [vmem:[%s1026_s3 + $0x188] sm:$0xff] %v333_v60  ;;  %v532_v10 = vunpack.c.l.bf16 %v573_v58  ;;  %v533_v11 = vunpack.c.h.bf16 %v573_v58 }
  0x3a   :  { %v338_v8 = vmax.f32 %v274_v61, 0.0  ;;  %v339_v9 = vmax.f32 %v275_v62, 0.0  ;;  %398 = vst [vmem:[%s1026_s3 + $0x190] sm:$0xff] %v334_v2  ;;  %399 = vst [vmem:[%s1026_s3 + $0x198] sm:$0xff] %v335_v3  ;;  %v536_v12 = vunpack.c.l.bf16 %v574_v63  ;;  %v537_v13 = vunpack.c.h.bf16 %v574_v63 }
  0x3b   :  { %400 = vst [vmem:[%s1026_s3 + $0x1a0] sm:$0xff] %v336_v4  ;;  %401 = vst [vmem:[%s1026_s3 + $0x1a8] sm:$0xff] %v337_v5  ;;  %v540_v14 = vunpack.c.l.bf16 %v575_v0  ;;  %v541_v15 = vunpack.c.h.bf16 %v575_v0  ;;  %v205_v16 = vmul.f32 %v532_v10, %v603_v1  ;;  %v206_v17 = vmul.f32 %v533_v11, %v603_v1 }
  0x3c   :  { %402 = vst [vmem:[%s1026_s3 + $0x1b0] sm:$0xff] %v338_v8  ;;  %403 = vst [vmem:[%s1026_s3 + $0x1b8] sm:$0xff] %v339_v9  ;;  %v544_v18 = vunpack.c.l.bf16 %v576_v6  ;;  %v545_v19 = vunpack.c.h.bf16 %v576_v6  ;;  %v207_v20 = vmul.f32 %v536_v12, %v603_v1  ;;  %v208_v21 = vmul.f32 %v537_v13, %v603_v1 }
  0x3d   :  { %v209_v22 = vmul.f32 %v540_v14, %v603_v1  ;;  %v210_v23 = vmul.f32 %v541_v15, %v603_v1  ;;  %v276_v24 = vadd.f32 %v617_v7, %v205_v16  ;;  %v277_v25 = vadd.f32 %v617_v7, %v206_v17 }
  0x3e   :  { %v211_v26 = vmul.f32 %v544_v18, %v603_v1  ;;  %v212_v27 = vmul.f32 %v545_v19, %v603_v1  ;;  %v278_v28 = vadd.f32 %v617_v7, %v207_v20  ;;  %v279_v29 = vadd.f32 %v617_v7, %v208_v21 }
  0x3f   :  { %v280_v30 = vadd.f32 %v617_v7, %v209_v22  ;;  %v281_v31 = vadd.f32 %v617_v7, %v210_v23  ;;  %v340_v32 = vmax.f32 %v276_v24, 0.0  ;;  %v341_v33 = vmax.f32 %v277_v25, 0.0 }
  0x40   :  { %v282_v34 = vadd.f32 %v617_v7, %v211_v26  ;;  %v283_v35 = vadd.f32 %v617_v7, %v212_v27  ;;  %v342_v36 = vmax.f32 %v278_v28, 0.0  ;;  %v343_v37 = vmax.f32 %v279_v29, 0.0 }
  0x41   :  { %v344_v38 = vmax.f32 %v280_v30, 0.0  ;;  %v345_v39 = vmax.f32 %v281_v31, 0.0  ;;  %404 = vst [vmem:[%s1026_s3 + $0x1c0] sm:$0xff] %v340_v32  ;;  %405 = vst [vmem:[%s1026_s3 + $0x1c8] sm:$0xff] %v341_v33 }
  0x42   :  { %v346_v1 = vmax.f32 %v282_v34, 0.0  ;;  %v347_v40 = vmax.f32 %v283_v35, 0.0  ;;  %406 = vst [vmem:[%s1026_s3 + $0x1d0] sm:$0xff] %v342_v36  ;;  %407 = vst [vmem:[%s1026_s3 + $0x1d8] sm:$0xff] %v343_v37 }
  0x43   :  { %408 = vst [vmem:[%s1026_s3 + $0x1e0] sm:$0xff] %v344_v38  ;;  %409 = vst [vmem:[%s1026_s3 + $0x1e8] sm:$0xff] %v345_v39 }
  0x44   :  { %410 = vst [vmem:[%s1026_s3 + $0x1f0] sm:$0xff] %v346_v1  ;;  %411 = vst [vmem:[%s1026_s3 + $0x1f8] sm:$0xff] %v347_v40 }

// kernel: cnn_layer_forward.2
= control target key start
LH: loop header
LB: loop body
LE: loop exit
PB: predicated region body
PF: predicated region fallthrough
CT: control target
= control target key end

     0   :  { %s1375_s12 = smov 0   ;;  %s1377_s13 = smov 0   ;;  %s1556_s0 = inlined_call_operand.vmem [shape: bf16[512,36], index: 0, kind: input, shape index: {}]   ;;  %s1557_s1 = inlined_call_operand.vmem [shape: bf16[36,128], index: 1, kind: input, shape index: {}]   ;;  %s1558_s2 = inlined_call_operand.vmem [shape: bf16[512,128], index: 2, kind: output, shape index: {0}]   ;;  %s1559_s3 = inlined_call_operand.vmem [shape: f32[2,2,128], index: 3, kind: output, shape index: {1}]  }
   0x1   :  { %s1379_s14 = smov 0  }
   0x2 LB: > { %s33_s15 = sadd.s32 1, %s1348_s13  ;;  %p1019_p0 = scmp.ge.s32.totalorder %s1352_s14, 1  ;;  %s1352_s14 = sphi %s1379_s14, %s14_s14   ;;  %s1348_s13 = sphi %s1377_s13, %s1561_s13   ;;  %s1344_s12 = sphi %s1375_s12, %s1560_s12  }
   0x3   : > { %p35_p1 = scmp.ge.s32.totalorder %s33_s15, 2  ;;  %p179_p2 = scmp.lt.s32.totalorder %s1352_s14, 3 }
   0x5   : > { %s1563_s15 = smov (%p35_p1, %s33_s15), 0  ;;  %p180_p3 = pnand %p1019_p0, %p179_p2 }
   0x6   : > { %s1020_s20 = sshll.u32 (!%p180_p3), %s1344_s12, 5  ;;  %p242_p5 = scmp.lt.s32.totalorder (!%p180_p3), %s1344_s12, 1 }
   0x7   : > { %183 = sbr.rel (%p180_p3) target bundleno = 312 (0x138), region = 28  ;;  %p221_p4 = scmp.lt.s32.totalorder (!%p180_p3), %s1020_s20, 63 }
   0xc   : > { %v1311_v0 = vld [vmem:[%s1557_s1 + $0x10] ss:$0 sps:$4 sm:$0x33]   ;;  %vm436_vm0 = vcmask 1041408   ;;  %v1312_v1 = vld [vmem:[%s1557_s1 + $0x8] sm:$0xff]   ;;  %v1313_v3 = vld [vmem:[%s1557_s1] sm:$0xff]  }
   0xd   : > { %1284 = vmatprep.subr.msk.bf16.mxu0 %vm436_vm0, %v1311_v0  ;;  %v438_v2 = vsel %vm436_vm0, %v1311_v0, 0  ;;  %1285 = vmatprep.subr.msk.bf16.mxu1 %vm436_vm0, %v1311_v0  ;;  %s1565_s20 = smov (!%p221_p4, %s1020_s20), 63  ;;  %vm387_vm1 = vcmask 293888   ;;  %v1354_v20 = vmov 0.0   ;;  %vm868_vm2 = vcmask 1040384   ;;  %s1567_s12 = smov (!%p242_p5, %s1344_s12), 1 }
   0xe   : > { %1241 = vmatpush3.bf16.msra.mxu0 %v438_v2  ;;  %1281 = vmatpush3.bf16.msra.mxu1 %v438_v2  ;;  %s1021_s23 = sshll.u32 %s1565_s20, 2  ;;  %254 = vst [vmem:[#allocation2] sm:$0x3] %v1354_v20  ;;  %s1024_s30 = sshll.u32 %s1567_s12, 1 }
   0xf   : > { %1242 = vmatprep.subr.bf16.mxu0 %v1312_v1  ;;  %1279 = vmatprep.subr.bf16.mxu1 %v1312_v1  ;;  %s1413_s26 = scalar_lea.vmem %s1556_s0, %s1021_s23  ;;  %s1452_s29 = scalar_lea.vmem %s1558_s2, %s1021_s23 }
  0x10   : > { %v1314_v4 = vld [vmem:[%s1413_s26] sm:$0xff]   ;;  %v1315_v5 = vld [vmem:[%s1413_s26 + $0x8] sm:$0xff]   ;;  %v1316_v6 = vld [vmem:[%s1413_s26 + $0x10] sm:$0xff]   ;;  %s248_s6 = scalar_lea.vmem %s1559_s3, %s1024_s30 }
  0x11   : > { %1246 = vmatprep.mubr.msk.bf16.mxu0 %vm387_vm1, %v1314_v4  ;;  %v1317_v7 = vld [vmem:[%s1413_s26 + $0x18] sm:$0xff]   ;;  %v1318_v8 = vld [vmem:[%s1413_s26 + $0x20] sm:$0xff]   ;;  %v1323_v10 = vld [vmem:[%s1413_s26 + $0x48] sm:$0xff]  }
  0x12   : > { %1243 = vmatpush3.bf16.msra.mxu0 %v1312_v1  ;;  %1282 = vmatpush3.bf16.msra.mxu1 %v1312_v1  ;;  %v1322_v9 = vld [vmem:[%s1413_s26 + $0x40] sm:$0xff]   ;;  %v1324_v11 = vld [vmem:[%s1413_s26 + $0x50] sm:$0xff]   ;;  %v1325_v12 = vld [vmem:[%s1413_s26 + $0x58] sm:$0xff]  }
  0x13   : > { %1244 = vmatprep.subr.bf16.mxu0 %v1313_v3  ;;  %1280 = vmatprep.subr.bf16.mxu1 %v1313_v3  ;;  %v1326_v13 = vld [vmem:[%s1413_s26 + $0x60] sm:$0xff]   ;;  %v1319_v14 = vld [vmem:[%s1413_s26 + $0x28] sm:$0xff]   ;;  %v1320_v15 = vld [vmem:[%s1413_s26 + $0x30] sm:$0xff]  }
  0x14   : > { %1262 = vmatprep.mubr.msk.bf16.mxu1 %vm387_vm1, %v1322_v9  ;;  %v1327_v16 = vld [vmem:[%s1413_s26 + $0x68] sm:$0xff]   ;;  %v1328_v17 = vld [vmem:[%s1413_s26 + $0x70] sm:$0xff]   ;;  %v1321_v18 = vld [vmem:[%s1413_s26 + $0x38] sm:$0xff]  }
  0x15   : > { %v1329_v19 = vld [vmem:[%s1413_s26 + $0x78] sm:$0xff]  }
  0x16   : > { %1245 = vmatpush3.bf16.msra.mxu0 %v1313_v3  ;;  %1283 = vmatpush3.bf16.msra.mxu1 %v1313_v3 }
  0x19   : > { %1247 = vmatmul.mubr.msk.bf16.vlgmr.msra.gmra.mxu0 %vm387_vm1, %v1315_v5  ;;  %1263 = vmatmul.mubr.msk.bf16.vlgmr.msra.gmra.mxu1 %vm387_vm1, %v1323_v10 }
  0x1a   : > { %1250 = vmatprep.mubr.msk.bf16.mxu0 %vm387_vm1, %v1316_v6  ;;  %1266 = vmatprep.mubr.msk.bf16.mxu1 %vm387_vm1, %v1324_v11 }
  0x21   : > { %1251 = vmatmul.mubr.msk.bf16.gmra.mxu0 %vm387_vm1, %v1317_v7  ;;  %1267 = vmatmul.mubr.msk.bf16.gmra.mxu1 %vm387_vm1, %v1325_v12 }
  0x22   : > { %1254 = vmatprep.mubr.msk.bf16.mxu0 %vm387_vm1, %v1318_v8  ;;  %1270 = vmatprep.mubr.msk.bf16.mxu1 %vm387_vm1, %v1326_v13 }
  0x29   : > { %1255 = vmatmul.mubr.msk.bf16.gmra.mxu0 %vm387_vm1, %v1319_v14  ;;  %1271 = vmatmul.mubr.msk.bf16.gmra.mxu1 %vm387_vm1, %v1327_v16 }
  0x2a   : > { %1258 = vmatprep.mubr.msk.bf16.mxu0 %vm387_vm1, %v1320_v15  ;;  %1274 = vmatprep.mubr.msk.bf16.mxu1 %vm387_vm1, %v1328_v17 }
  0x31   : > { %1259 = vmatmul.mubr.msk.bf16.gmra.mxu0 %vm387_vm1, %v1321_v18  ;;  %1275 = vmatmul.mubr.msk.bf16.gmra.mxu1 %vm387_vm1, %v1329_v19 }
  0xd9   : > { %v1248_v21 = vpop.f32.mrf.mxu0  ;;  %v1454_v26 = vpop.f32.mrf.mxu1 }
  0xda   : > { %v801_v33 = vmul.f32 %v1248_v21, %v1248_v21 }
  0xdb   : > { %v474_v22 = vpop.f32.mrf.mxu0  ;;  %v1457_v32 = vpop.f32.mrf.mxu1 }
  0xdc   : > { %v799_v27 = vmul.f32 %v474_v22, %v474_v22 }
  0xdd   : > { %v1249_v23 = vpop.f32.mrf.mxu0  ;;  %v1460_v37 = vpop.f32.mrf.mxu1 }
  0xde   : > { %v1134_v24 = vpack.c.bf16 %v1249_v23, %v1248_v21  ;;  %v802_v38 = vmul.f32 %v1249_v23, %v1249_v23  ;;  %v1174_v41 = vpack.c.bf16 %v1460_v37, %v1454_v26 }
  0xdf   : > { %v477_v25 = vpop.f32.mrf.mxu0  ;;  %v1464_v43 = vpop.f32.mrf.mxu1 }
  0xe0   : > { %1206 = vst [vmem:[%s1452_s29 + $0x8] sm:$0xff] %v1134_v24   ;;  %v1129_v28 = vpack.c.bf16 %v477_v25, %v474_v22  ;;  %v762_v29 = vadd.f32 %v477_v25, %v474_v22  ;;  %v800_v30 = vmul.f32 %v477_v25, %v477_v25  ;;  %1214 = vst [vmem:[%s1452_s29 + $0x48] sm:$0xff] %v1174_v41  }
  0xe1   : > { %v1252_v31 = vpop.f32.mrf.mxu0  ;;  %v1169_v49 = vpack.c.bf16 %v1464_v43, %v1457_v32  ;;  %v1469_v50 = vpop.f32.mrf.mxu1 }
  0xe2   : > { %1130 = vst [vmem:[%s1452_s29] sm:$0xff] %v1129_v28   ;;  %v763_v34 = vadd.f32 %v1248_v21, %v762_v29  ;;  %v831_v35 = vadd.f32 %v800_v30, %v799_v27  ;;  %v805_v57 = vmul.f32 %v1252_v31, %v1252_v31 }
  0xe3   : > { %v490_v36 = vpop.f32.mrf.mxu0  ;;  %1213 = vst [vmem:[%s1452_s29 + $0x40] sm:$0xff] %v1169_v49   ;;  %v1473_v56 = vpop.f32.mrf.mxu1 }
  0xe4   : > { %v832_v39 = vadd.f32 %v831_v35, %v801_v33  ;;  %v764_v40 = vadd.f32 %v1249_v23, %v763_v34  ;;  %v803_v45 = vmul.f32 %v490_v36, %v490_v36 }
  0xe5   : > { %v1253_v42 = vpop.f32.mrf.mxu0  ;;  %v1476_v61 = vpop.f32.mrf.mxu1 }
  0xe6   : > { %v765_v44 = vadd.f32 %v764_v40, %v490_v36  ;;  %v833_v46 = vadd.f32 %v832_v39, %v802_v38  ;;  %v1144_v47 = vpack.c.bf16 %v1253_v42, %v1252_v31  ;;  %v806_v62 = vmul.f32 %v1253_v42, %v1253_v42 }
  0xe7   : > { %v493_v48 = vpop.f32.mrf.mxu0  ;;  %v1184_v1 = vpack.c.bf16 %v1476_v61, %v1469_v50  ;;  %v1480_v3 = vpop.f32.mrf.mxu1 }
  0xe8   : > { %v834_v51 = vadd.f32 %v833_v46, %v803_v45  ;;  %1208 = vst [vmem:[%s1452_s29 + $0x18] sm:$0xff] %v1144_v47   ;;  %v1139_v52 = vpack.c.bf16 %v493_v48, %v490_v36  ;;  %v766_v53 = vadd.f32 %v765_v44, %v493_v48  ;;  %v804_v54 = vmul.f32 %v493_v48, %v493_v48 }
  0xe9   : > { %v1256_v55 = vpop.f32.mrf.mxu0  ;;  %1216 = vst [vmem:[%s1452_s29 + $0x58] sm:$0xff] %v1184_v1   ;;  %v1179_v9 = vpack.c.bf16 %v1480_v3, %v1473_v56  ;;  %v1485_v10 = vpop.f32.mrf.mxu1 }
  0xea   : > { %1207 = vst [vmem:[%s1452_s29 + $0x10] sm:$0xff] %v1139_v52   ;;  %v767_v58 = vadd.f32 %v1252_v31, %v766_v53  ;;  %v835_v59 = vadd.f32 %v834_v51, %v804_v54  ;;  %v809_v17 = vmul.f32 %v1256_v55, %v1256_v55  ;;  %v815_v54 = vmul.f32 %v1457_v32, %v1457_v32 }
  0xeb   : > { %v506_v60 = vpop.f32.mrf.mxu0  ;;  %1215 = vst [vmem:[%s1452_s29 + $0x50] sm:$0xff] %v1179_v9   ;;  %v1489_v16 = vpop.f32.mrf.mxu1  ;;  %v820_v9 = vmul.f32 %v1480_v3, %v1480_v3 }
  0xec   : > { %v836_v63 = vadd.f32 %v835_v59, %v805_v57  ;;  %v768_v0 = vadd.f32 %v1253_v42, %v767_v58  ;;  %v807_v5 = vmul.f32 %v506_v60, %v506_v60 }
  0xed   : > { %v1257_v2 = vpop.f32.mrf.mxu0  ;;  %v1492_v21 = vpop.f32.mrf.mxu1 }
  0xee   : > { %v769_v4 = vadd.f32 %v768_v0, %v506_v60  ;;  %v837_v6 = vadd.f32 %v836_v63, %v806_v62  ;;  %v1154_v7 = vpack.c.bf16 %v1257_v2, %v1256_v55  ;;  %v810_v22 = vmul.f32 %v1257_v2, %v1257_v2 }
  0xef   : > { %v509_v8 = vpop.f32.mrf.mxu0  ;;  %v1194_v25 = vpack.c.bf16 %v1492_v21, %v1485_v10  ;;  %v573_v28 = vpop.f32.mrf.mxu1  ;;  %v817_v63 = vmul.f32 %v1454_v26, %v1454_v26 }
  0xf0   : > { %v838_v11 = vadd.f32 %v837_v6, %v807_v5  ;;  %1210 = vst [vmem:[%s1452_s29 + $0x28] sm:$0xff] %v1154_v7   ;;  %v1149_v12 = vpack.c.bf16 %v509_v8, %v506_v60  ;;  %v770_v13 = vadd.f32 %v769_v4, %v509_v8  ;;  %v808_v14 = vmul.f32 %v509_v8, %v509_v8 }
  0xf1   : > { %v1260_v15 = vpop.f32.mrf.mxu0  ;;  %1218 = vst [vmem:[%s1452_s29 + $0x68] sm:$0xff] %v1194_v25   ;;  %v1189_v35 = vpack.c.bf16 %v573_v28, %v1489_v16  ;;  %v1498_v36 = vpop.f32.mrf.mxu1  ;;  %v816_v60 = vmul.f32 %v1464_v43, %v1464_v43  ;;  %v819_v6 = vmul.f32 %v1473_v56, %v1473_v56 }
  0xf2   : > { %1209 = vst [vmem:[%s1452_s29 + $0x20] sm:$0xff] %v1149_v12   ;;  %v771_v18 = vadd.f32 %v1256_v55, %v770_v13  ;;  %v839_v19 = vadd.f32 %v838_v11, %v808_v14  ;;  %v813_v44 = vmul.f32 %v1260_v15, %v1260_v15 }
  0xf3   : > { %v522_v20 = vpop.f32.mrf.mxu0  ;;  %1217 = vst [vmem:[%s1452_s29 + $0x60] sm:$0xff] %v1189_v35   ;;  %v586_v42 = vpop.f32.mrf.mxu1 }
  0xf4   : > { %v840_v23 = vadd.f32 %v839_v19, %v809_v17  ;;  %v772_v24 = vadd.f32 %v1257_v2, %v771_v18  ;;  %v811_v30 = vmul.f32 %v522_v20, %v522_v20  ;;  %v818_v2 = vmul.f32 %v1460_v37, %v1460_v37 }
  0xf5   : > { %v1261_v27 = vpop.f32.mrf.mxu0  ;;  %v1277_v47 = vpop.f32.mrf.mxu1  ;;  %v824_v19 = vmul.f32 %v573_v28, %v573_v28 }
  0xf6   : > { %v773_v29 = vadd.f32 %v772_v24, %v522_v20  ;;  %v841_v31 = vadd.f32 %v840_v23, %v810_v22  ;;  %v1164_v33 = vpack.c.bf16 %v1261_v27, %v1260_v15  ;;  %v814_v48 = vmul.f32 %v1261_v27, %v1261_v27 }
  0xf7   : > { %v525_v34 = vpop.f32.mrf.mxu0  ;;  %v1204_v52 = vpack.c.bf16 %v1277_v47, %v1498_v36  ;;  %v589_v53 = vpop.f32.mrf.mxu1  ;;  %v826_v23 = vmul.f32 %v1492_v21, %v1492_v21 }
  0xf8   : > { %v842_v38 = vadd.f32 %v841_v31, %v811_v30  ;;  %1212 = vst [vmem:[%s1452_s29 + $0x38] sm:$0xff] %v1164_v33   ;;  %v1159_v39 = vpack.c.bf16 %v525_v34, %v522_v20  ;;  %v774_v40 = vadd.f32 %v773_v29, %v525_v34  ;;  %v812_v41 = vmul.f32 %v525_v34, %v525_v34 }
  0xf9   : > { %1220 = vst [vmem:[%s1452_s29 + $0x78] sm:$0xff] %v1204_v52   ;;  %v1199_v58 = vpack.c.bf16 %v589_v53, %v586_v42  ;;  %v825_v20 = vmul.f32 %v1485_v10, %v1485_v10  ;;  %v828_v31 = vmul.f32 %v589_v53, %v589_v53  ;;  %v830_v34 = vmul.f32 %v1277_v47, %v1277_v47 }
  0xfa   : > { %1211 = vst [vmem:[%s1452_s29 + $0x30] sm:$0xff] %v1159_v39   ;;  %v775_v45 = vadd.f32 %v1260_v15, %v774_v40  ;;  %v843_v46 = vadd.f32 %v842_v38, %v812_v41  ;;  %v823_v15 = vmul.f32 %v1489_v16, %v1489_v16 }
  0xfb   : > { %1219 = vst [vmem:[%s1452_s29 + $0x70] sm:$0xff] %v1199_v58  }
  0xfc   : > { %v776_v49 = vadd.f32 %v1261_v27, %v775_v45  ;;  %v844_v51 = vadd.f32 %v843_v46, %v813_v44  ;;  %v827_v27 = vmul.f32 %v586_v42, %v586_v42 }
  0xfe   : > { %v845_v55 = vadd.f32 %v844_v51, %v814_v48  ;;  %v777_v57 = vadd.f32 %v776_v49, %v1457_v32 }
 0x100   : > { %v778_v59 = vadd.f32 %v777_v57, %v1464_v43  ;;  %v846_v62 = vadd.f32 %v845_v55, %v815_v54 }
 0x102   : > { %v779_v0 = vadd.f32 %v1454_v26, %v778_v59  ;;  %v847_v1 = vadd.f32 %v846_v62, %v816_v60  ;;  %v821_v26 = vmul.f32 %v1469_v50, %v1469_v50 }
 0x104   : > { %v848_v4 = vadd.f32 %v847_v1, %v817_v63  ;;  %v780_v32 = vadd.f32 %v1460_v37, %v779_v0  ;;  %v822_v37 = vmul.f32 %v1476_v61, %v1476_v61 }
 0x106   : > { %v781_v5 = vadd.f32 %v780_v32, %v1473_v56  ;;  %v849_v43 = vadd.f32 %v848_v4, %v818_v2 }
 0x108   : > { %v850_v7 = vadd.f32 %v849_v43, %v819_v6  ;;  %v782_v8 = vadd.f32 %v781_v5, %v1480_v3 }
 0x10a   : > { %v783_v11 = vadd.f32 %v1469_v50, %v782_v8  ;;  %v851_v12 = vadd.f32 %v850_v7, %v820_v9 }
 0x10c   : > { %v852_v13 = vadd.f32 %v851_v12, %v821_v26  ;;  %v784_v14 = vadd.f32 %v1476_v61, %v783_v11 }
 0x10e   : > { %v785_v56 = vadd.f32 %v784_v14, %v1489_v16  ;;  %v853_v17 = vadd.f32 %v852_v13, %v822_v37 }
 0x110   : > { %v854_v18 = vadd.f32 %v853_v17, %v823_v15  ;;  %v786_v3 = vadd.f32 %v785_v56, %v573_v28  ;;  %v829_v28 = vmul.f32 %v1498_v36, %v1498_v36 }
 0x112   : > { %v787_v50 = vadd.f32 %v1485_v10, %v786_v3  ;;  %v855_v22 = vadd.f32 %v854_v18, %v824_v19 }
 0x114   : > { %v856_v24 = vadd.f32 %v855_v22, %v825_v20  ;;  %v788_v61 = vadd.f32 %v1492_v21, %v787_v50 }
 0x116   : > { %v789_v25 = vadd.f32 %v788_v61, %v586_v42  ;;  %v857_v29 = vadd.f32 %v856_v24, %v826_v23 }
 0x118   : > { %v858_v16 = vadd.f32 %v857_v29, %v827_v27  ;;  %v790_v30 = vadd.f32 %v789_v25, %v589_v53 }
 0x11a   : > { %v791_v33 = vadd.f32 %v1498_v36, %v790_v30  ;;  %v859_v10 = vadd.f32 %v858_v16, %v828_v31  ;;  %v761_v36 = vld [vmem:[#allocation2] sm:$0x3] }
 0x11c   : > { %v792_v35 = vadd.f32 %v1277_v47, %v791_v33  ;;  %v860_v38 = vadd.f32 %v859_v10, %v829_v28 }
 0x11e   : > { %v793_v39 = vrot.slane %v792_v35, 4  ;;  %v861_v40 = vadd.f32 %v860_v38, %v830_v34 }
 0x120   : > { %v794_v21 = vadd.f32 %v793_v39, %v792_v35  ;;  %v862_v41 = vrot.slane %v861_v40, 4 }
 0x122   : > { %v795_v42 = vrot.slane %v794_v21, 2  ;;  %v863_v44 = vadd.f32 %v862_v41, %v861_v40 }
 0x124   : > { %v796_v45 = vadd.f32 %v795_v42, %v794_v21  ;;  %v864_v46 = vrot.slane %v863_v44, 2 }
 0x126   : > { %v797_v48 = vrot.slane %v796_v45, 1  ;;  %v865_v49 = vadd.f32 %v864_v46, %v863_v44 }
 0x128   : > { %v866_v51 = vrot.slane %v865_v49, 1  ;;  %v798_v52 = vadd.f32 %v797_v48, %v796_v45 }
 0x12a   : > { %v867_v53 = vadd.f32 %v866_v51, %v865_v49 }
 0x12c   : > { %v869_v54 = vsel %vm868_vm2, %v798_v52, %v867_v53 }
 0x12d   : > { %v870_v47 = vadd.f32 %v869_v54, %v761_v36 }
 0x12f   : > { %871 = vst [vmem:[#allocation2] sm:$0x3] %v870_v47 }
 0x136   : > { %v875_v55 = vld [vmem:[#allocation2] sm:$0x3] }
 0x137   : > { %876 = vst [vmem:[%s248_s6] sm:$0x3] %v875_v55 }
 0x138 PF: > { %s14_s14 = sadd.s32 1, %s1352_s14   ;;  %s1560_s12 = smov %s1348_s13 }
 0x139   : > { %p11_p6 = scmp.ge.s32.totalorder %s14_s14, 4   ;;  %s1561_s13 = smov %s1563_s15 }
 0x13b   :  { %13 = sbr.rel (!%p11_p6) target bundleno = 2 (0x2), region = 81 }

</bundles_post_ra>
